<compile_context>
chip_gen: v7x
topology: tpu7x:2x2x1
jax: 0.10.0
libtpu: 0.0.40
codegen_flags: <defaults>
</compile_context>

<pallas_src>
import functools

import jax
import jax.numpy as jnp
from jax.experimental import pallas as pl
from jax.experimental.pallas import tpu as pltpu


def _layernorm1d_kernel(x_ref, g_ref, b_ref, o_ref, *, eps, d_model):
    # x_ref: (block_rows, d_model); g_ref/b_ref: (1, d_model)
    x = x_ref[...].astype(jnp.float32)

    # Two-pass / centered statistics. The centered tile is reused below for
    # the normalization, so this costs the same as the single-pass form while
    # avoiding the ss - n*mean^2 cancellation.
    mean = jnp.sum(x, axis=-1, keepdims=True) * (1.0 / d_model)
    centered = x - mean
    # ddof=1 (torch.std default). NOTE: torch.std of a single element is NaN;
    # here d_model == 1 is clamped to a divisor of 1 (intentional divergence).
    var = jnp.sum(centered * centered, axis=-1, keepdims=True) / max(d_model - 1, 1)
    std = jnp.sqrt(var)

    # One exact reciprocal per row ((block_rows, 1) column), then a broadcast
    # VPU multiply over the full tile instead of a tile-wide divide.
    inv = pl.reciprocal(std + eps, approx=False)

    gamma = g_ref[...].astype(jnp.float32)
    beta = b_ref[...].astype(jnp.float32)

    o_ref[...] = (centered * inv * gamma + beta).astype(o_ref.dtype)


def _sublane_multiple(dtype):
    itemsize = jnp.dtype(dtype).itemsize
    if itemsize >= 4:
        return 8
    if itemsize == 2:
        return 16
    return 32


def _choose_block_rows(n_rows, d_model, dtype):
    """Row tile: largest sublane-aligned block within a conservative VMEM budget,
    capped so that the grid has at least ~4 steps for large inputs."""
    itemsize = jnp.dtype(dtype).itemsize
    mult = _sublane_multiple(dtype)

    # Per-row VMEM cost of one grid step: double-buffered input + output tiles
    # in the input dtype plus ~3 f32 temporaries per row (x upcast, centered,
    # y). 24 MiB of buffers -> ~4-6 MiB input tiles, comfortably inside the
    # 48 MiB vmem_limit below and v7x's 64 MiB physical VMEM.
    budget = 24 * 1024 * 1024
    per_row = d_model * (4 * itemsize + 3 * 4)
    max_rows = max(mult, budget // per_row)
    block = min(2048, (max_rows // mult) * mult)
    block = max(block, mult)

    # Guarantee >= ~4 grid steps when the input is large enough: with a single
    # block there is nothing for the DMA pipeline to overlap with and only one
    # of v7x's two TensorCores gets work.
    quarter = ((n_rows // 4) // mult) * mult
    cap = max(mult, quarter)
    return max(mult, min(block, cap))


def layernorm1d(x, a_2, b_2, eps=1e-6):
    """LayerNorm1D forward: a_2 * (x - mean) / (std + eps) + b_2 (std is ddof=1)."""
    orig_shape = x.shape
    d_model = orig_shape[-1]
    x2 = x.reshape(-1, d_model)
    n_rows = x2.shape[0]

    block_rows = _choose_block_rows(n_rows, d_model, x.dtype)
    grid = (pl.cdiv(n_rows, block_rows),)

    gamma = a_2.reshape(1, d_model)
    beta = b_2.reshape(1, d_model)

    # TODO(synk): if production d_model is small (<128) or not a multiple of
    # 128, stores are masked (not lane-dense); pad the feature axis to 128 at
    # the model level or repack rows into lanes with a segmented reduction.
    out2 = pl.pallas_call(
        functools.partial(_layernorm1d_kernel, eps=float(eps), d_model=d_model),
        out_shape=jax.ShapeDtypeStruct((n_rows, d_model), x.dtype),
        grid_spec=pltpu.PrefetchScalarGridSpec(
            num_scalar_prefetch=0,
            grid=grid,
            in_specs=[
                pl.BlockSpec((block_rows, d_model), lambda i: (i, 0)),
                pl.BlockSpec((1, d_model), lambda i: (0, 0)),
                pl.BlockSpec((1, d_model), lambda i: (0, 0)),
            ],
            out_specs=pl.BlockSpec((block_rows, d_model), lambda i: (i, 0)),
        ),
        compiler_params=pltpu.CompilerParams(
            dimension_semantics=("parallel",),
            vmem_limit_bytes=48 * 1024 * 1024,
        ),
    )(x2, gamma, beta)

    return out2.reshape(orig_shape)


if __name__ == "__main__":
    key = jax.random.PRNGKey(0)
    batch, seq, d_model = 2, 8, 32

    x = jax.random.normal(key, (batch, seq, d_model), dtype=jnp.float32)

    # Deterministic parameter init matching nn.Parameter(torch.ones/zeros(d_model))
    a_2 = jnp.ones((d_model,), dtype=jnp.float32)
    b_2 = jnp.zeros((d_model,), dtype=jnp.float32)

    out = layernorm1d(x, a_2, b_2, eps=1e-6)
    out = jax.block_until_ready(out)

    # Pure-JAX reference (unbiased std, matching torch.std default).
    mean = jnp.mean(x, axis=-1, keepdims=True)
    std = jnp.sqrt(
        jnp.sum((x - mean) ** 2, axis=-1, keepdims=True) / (d_model - 1)
    )
    ref = a_2 * (x - mean) / (std + 1e-6) + b_2
    assert jnp.allclose(out, ref, atol=1e-5, rtol=1e-5), "mismatch vs reference"

    print("KERNEL_OK")
</pallas_src>

<mosaic_0001>
module attributes {stable_mosaic.version = 11 : i64} {
  func.func @_layernorm1d_kernel(%arg0: i32, %arg1: memref<8x32xf32, #tpu.memory_space<vmem>>, %arg2: memref<1x32xf32, #tpu.memory_space<vmem>>, %arg3: memref<1x32xf32, #tpu.memory_space<vmem>>, %arg4: memref<8x32xf32, #tpu.memory_space<vmem>>) attributes {dimension_semantics = [#tpu.dimension_semantics<parallel>], iteration_bounds = array<i64: 2>, scalar_prefetch = 0 : i64, scratch_operands = 0 : i64, tpu.core_type = #tpu.core_type<tc>, window_params = [{transform_indices = @transform_0, window_bounds = array<i64: 8, 32>}, {pipeline_mode = #tpu.pipeline_mode<synchronous>, transform_indices = @transform_1, window_bounds = array<i64: 1, 32>}, {pipeline_mode = #tpu.pipeline_mode<synchronous>, transform_indices = @transform_2, window_bounds = array<i64: 1, 32>}, {transform_indices = @transform_3, window_bounds = array<i64: 8, 32>}]} {
    %c0 = arith.constant 0 : index
    %c0_0 = arith.constant 0 : index
    %0 = vector.load %arg1[%c0, %c0_0] : memref<8x32xf32, #tpu.memory_space<vmem>>, vector<8x32xf32>
    %cst = arith.constant dense<0.000000e+00> : vector<8xf32>
    %1 = vector.multi_reduction <add>, %0, %cst [1] : vector<8x32xf32> to vector<8xf32>
    %2 = vector.shape_cast %1 : vector<8xf32> to vector<8x1xf32>
    %cst_1 = arith.constant 3.125000e-02 : f32
    %3 = vector.broadcast %cst_1 : f32 to vector<8x1xf32>
    %4 = arith.mulf %2, %3 : vector<8x1xf32>
    %5 = vector.broadcast %4 : vector<8x1xf32> to vector<8x32xf32>
    %6 = arith.subf %0, %5 : vector<8x32xf32>
    %7 = arith.mulf %6, %6 : vector<8x32xf32>
    %cst_2 = arith.constant dense<0.000000e+00> : vector<8xf32>
    %8 = vector.multi_reduction <add>, %7, %cst_2 [1] : vector<8x32xf32> to vector<8xf32>
    %9 = vector.shape_cast %8 : vector<8xf32> to vector<8x1xf32>
    %cst_3 = arith.constant 3.100000e+01 : f32
    %10 = vector.broadcast %cst_3 : f32 to vector<8x1xf32>
    %11 = arith.divf %9, %10 : vector<8x1xf32>
    %12 = math.sqrt %11 : vector<8x1xf32>
    %cst_4 = arith.constant 9.99999997E-7 : f32
    %13 = vector.broadcast %cst_4 : f32 to vector<8x1xf32>
    %14 = arith.addf %12, %13 : vector<8x1xf32>
    %15 = tpu.reciprocal %14 : vector<8x1xf32> -> vector<8x1xf32>
    %c0_5 = arith.constant 0 : index
    %c0_6 = arith.constant 0 : index
    %16 = vector.load %arg2[%c0_5, %c0_6] : memref<1x32xf32, #tpu.memory_space<vmem>>, vector<1x32xf32>
    %c0_7 = arith.constant 0 : index
    %c0_8 = arith.constant 0 : index
    %17 = vector.load %arg3[%c0_7, %c0_8] : memref<1x32xf32, #tpu.memory_space<vmem>>, vector<1x32xf32>
    %18 = vector.broadcast %15 : vector<8x1xf32> to vector<8x32xf32>
    %19 = arith.mulf %6, %18 : vector<8x32xf32>
    %20 = vector.broadcast %16 : vector<1x32xf32> to vector<8x32xf32>
    %21 = arith.mulf %19, %20 : vector<8x32xf32>
    %22 = vector.broadcast %17 : vector<1x32xf32> to vector<8x32xf32>
    %23 = arith.addf %21, %22 : vector<8x32xf32>
    %c0_9 = arith.constant 0 : index
    %c0_10 = arith.constant 0 : index
    %24 = vector.load %arg4[%c0_9, %c0_10] : memref<8x32xf32, #tpu.memory_space<vmem>>, vector<8x32xf32>
    tpu.vector_store %arg4[%c0_9, %c0_10], %23 {strides = array<i32>} : memref<8x32xf32, #tpu.memory_space<vmem>>, vector<8x32xf32>,
    return
  }
  func.func @transform_0(%arg0: i32) -> (i32, i32) {
    %c0_i32 = arith.constant 0 : i32
    %c0_i32_0 = arith.constant 0 : i32
    return %arg0, %c0_i32 : i32, i32
  }
  func.func @transform_1(%arg0: i32) -> (i32, i32) {
    %c0_i32 = arith.constant 0 : i32
    %c0_i32_0 = arith.constant 0 : i32
    %c0_i32_1 = arith.constant 0 : i32
    return %c0_i32, %c0_i32_0 : i32, i32
  }
  func.func @transform_2(%arg0: i32) -> (i32, i32) {
    %c0_i32 = arith.constant 0 : i32
    %c0_i32_0 = arith.constant 0 : i32
    %c0_i32_1 = arith.constant 0 : i32
    return %c0_i32, %c0_i32_0 : i32, i32
  }
  func.func @transform_3(%arg0: i32) -> (i32, i32) {
    %c0_i32 = arith.constant 0 : i32
    %c0_i32_0 = arith.constant 0 : i32
    return %arg0, %c0_i32 : i32, i32
  }
}

</mosaic_0001>

<bundles_post_ra>
// kernel: tpu_custom_call.1
= control target key start
LH: loop header
LB: loop body
LE: loop exit
PB: predicated region body
PF: predicated region fallthrough
CT: control target
= control target key end

     0   :  { %8 = vsyncpa [#allocation3], 0  ;;  %s668_s0 = inlined_call_operand.hbm [shape: f32[16,32], index: 0, kind: input, shape index: {}]   ;;  %s669_s1 = inlined_call_operand.vmem [shape: f32[1,32], index: 1, kind: input, shape index: {}]   ;;  %s670_s2 = inlined_call_operand.vmem [shape: f32[1,32], index: 2, kind: input, shape index: {}]   ;;  %s671_s3 = inlined_call_operand.hbm [shape: f32[16,32], index: 3, kind: output, shape index: {}]  }
   0x1   :  { %10 = vsyncpa [#allocation3 + $0x1], 0 }
   0x2   :  { %11 = vsyncpa [#allocation4], 0 }
   0x3   :  { %13 = vsyncpa [#allocation4 + $0x1], 0  ;;  %s494_s12 = smov 0   ;;  %s496_s13 = smov 0  }
   0x4   :  { %s498_s14 = smov 0   ;;  %s500_s15 = smov 0  }
   0x5 LB: > { %s515_s16 = sadd.s32 4294967295, %s470_s15   ;;  %s310_s17 = sadd.s32 4294967294, %s470_s15   ;;  %s470_s15 = sphi %s500_s15, %s686_s15   ;;  %s466_s14 = sphi %s498_s14, %s685_s14   ;;  %s462_s13 = sphi %s496_s13, %s684_s13   ;;  %s458_s12 = sphi %s494_s12, %s683_s12  }
   0x6   : > { %s519_s18 = sadd.s32 1, %s470_s15   ;;  %s26_s19 = sadd.s32 1, %s466_s14 }
   0x7   : > { %s23_s20 = ssub.s32 %s470_s15, %s519_s18  ;;  %p33_p0 = scmp.ne.s32.totalorder %s466_s14, %s462_s13 }
   0x8   : > { %p24_p1 = scmp.eq.s32.totalorder %s23_s20, 0  ;;  %p34_p2 = scmp.eq.s32.totalorder %s470_s15, 0 }
   0x9   : > { %p39_p3 = scmp.ne.s32.totalorder %s462_s13, %s458_s12  ;;  %p40_p4 = scmp.eq.s32.totalorder %s515_s16, 0 }
   0xa   : > { %s531_s21 = scalar_select %p24_p1, %s466_s14, %s26_s19  }
   0xb   : > { %p533_p5 = por %p34_p2, %p33_p0  ;;  %p537_p6 = por %p40_p4, %p39_p3 }
   0xc   : > { %p105_p7 = scmp.eq.s32.totalorder %s515_s16, 1  ;;  %p111_p8 = scmp.eq.s32.totalorder %s310_s17, 1 }
   0xd   : > { %p336_p10 = scmp.lt.s32.totalorder %s470_s15, 2  ;;  %s137_s26 = sand.u32 1, %s466_s14  }
   0xe   : > { %p544_p11 = por %p105_p7, %p33_p0  ;;  %p548_p12 = por %p111_p8, %p39_p3 }
   0xf   : > { %s314_s27 = sshll.u32 %s470_s15, 7  ;;  %s313_s28 = sshll.u32 %s137_s26, 3 }
  0x10   : > { %s675_s24 = scalar_select %p544_p11, 1, 0 }
  0x11   : > { %s676_s25 = scalar_select %p548_p12, 1, 0 }
  0x12   : > { %s557_s4 = scalar_lea.hbm %s668_s0, %s314_s27  ;;  %s141_s5 = scalar_lea.vmem [#allocation2], %s313_s28 }
  0x13   : > { %s148_s6 = sshll.u32 %s141_s5, 4  ;;  %p561_p13 = pnand %p336_p10, %p533_p5  ;;  %s565_s6 = int_to_ptr.vmem [resolvable:$true] %s148_s6 }
  0x14   : > { %s138_s8 = scalar_lea.sflag [#allocation3], %s137_s26  ;;  %s374_s9 = scalar_lea.hbm %s557_s4, 128 }
  0x15   : > { %p375_p2 = scmp.ne.s32.totalorder %s557_s4, %s374_s9  ;;  %p376_p3 = pneg %p561_p13 }
  0x16   : > { %s379_s17 = scalar_lea.hbm %s668_s0, 256  ;;  %p380_p5 = scmp.lt.u32.totalorder %s557_s4, %s668_s0 }
  0x17   : > { %p377_p4 = pnand %p376_p3, %p375_p2  ;;  %p381_p8 = scmp.lt.u32.totalorder %s379_s17, %s374_s9 }
  0x18   : > { %p383_p9 = scmp.lt.u32.totalorder %s374_s9, %s557_s4 }
  0x19   : > { %p378_p7 = pneg %p377_p4  ;;  %p382_p10 = por %p381_p8, %p380_p5 }
  0x1b   : > { %p384_p0 = por %p383_p9, %p382_p10 }
  0x1d   : > { %p385_p1 = pnand %p384_p0, %p378_p7 }
  0x1f   : > { %388 = shalt.err (!%p385_p1)
}
  0x20   : > { %s389_s22 = scalar_lea.vmem %s565_s6, 128  ;;  %s472_s26 = smov [#allocation2]  }
  0x21   : > { %p390_p2 = scmp.ne.s32.totalorder %s565_s6, %s389_s22  ;;  %s394_s27 = sshll.u32 %s472_s26, 4  ;;  %s395_s27 = int_to_ptr.vmem [resolvable:$false] %s394_s27 }
  0x22   : > { %s396_s28 = scalar_lea.vmem %s395_s27, 256  ;;  %p397_p11 = scmp.lt.s32.totalorder %s565_s6, %s395_s27 }
  0x23   : > { %p392_p4 = pnand %p390_p2, %p376_p3  ;;  %p398_p5 = scmp.lt.s32.totalorder %s396_s28, %s389_s22 }
  0x25   : > { %p393_p12 = pneg %p392_p4  ;;  %p399_p8 = por %p398_p5, %p397_p11 }
  0x27   : > { %p400_p9 = pnand %p399_p8, %p393_p12 }
  0x29   : > { %403 = shalt.err (!%p400_p9)
}
  0x2a   : > { %331 = dma.hbm_to_vmem [thread:$0]  (!%p561_p13), %s557_s4, 128, %s565_s6, %s138_s8  }
  0x2b   : > { %p678_p0 = scmp.lt.s32.totalorder %s470_s15, 3  ;;  %p679_p1 = scmp.ge.s32.totalorder %s470_s15, 1 }
  0x2d   : > { %p154_p3 = pnand %p679_p1, %p678_p0 }
  0x2e   : > { %s599_s29 = sand.u32 (!%p154_p3), 1, %s462_s13  }
  0x2f   : > { %157 = sbr.rel (%p154_p3) target bundleno = 398 (0x18e), region = 32  ;;  %s316_s30 = sshll.u32 (!%p154_p3), %s599_s29, 3 }
  0x30   : > { %s160_s5 = scalar_lea.sflag (!%p154_p3), [#allocation3], %s599_s29  ;;  %s163_s7 = scalar_lea.vmem (!%p154_p3), [#allocation2], %s316_s30 }
  0x36   : > { %449 = dma.done.wait (%p537_p6), %s160_s5, 128  }
  0x37   : > { %451 = vsyncadd (%p537_p6), %s160_s5, 4294967168  ;;  %vm187_vm0 = vcmask 261120   ;;  %v186_v0 = vld [vmem:[%s163_s7] sm:$0xff]  ;;  %s321_s9 = sshll.u32 %s515_s16, 7  ;;  %s185_s10 = scalar_lea.vmem [#allocation5], %s316_s30 }
  0x38   : > { %v188_v1 = vsel %vm187_vm0, %v186_v0, 0.0  ;;  %v318_v16 = vld [vmem:[%s669_s1] ss:$0 sm:$0xff]  ;;  %s240_s11 = sshll.u32 %s185_s10, 4  ;;  %s623_s20 = scalar_lea.hbm %s671_s3, %s321_s9  ;;  %s625_s11 = int_to_ptr.vmem [resolvable:$true] %s240_s11 }
  0x39   : > { %189 = vadd.xlane.f32.xlu0 %v188_v1  ;;  %v319_v18 = vld [vmem:[%s670_s2] ss:$0 sm:$0xff]  ;;  %s227_s22 = scalar_lea.sflag [#allocation4], %s599_s29  ;;  %s404_s26 = scalar_lea.vmem %s625_s11, 128 }
  0x3a   : > { %p405_p6 = scmp.ne.s32.totalorder %s625_s11, %s404_s26  ;;  %p680_p11 = scmp.ne.s32.totalorder %s675_s24, 0 }
  0x3b   : > { %s473_s16 = smov [#allocation5]  }
  0x3c   : > { %p406_p12 = pnand %p405_p6, %p680_p11  ;;  %s408_s27 = sshll.u32 %s473_s16, 4  ;;  %s409_s27 = int_to_ptr.vmem [resolvable:$false] %s408_s27 }
  0x3d   : > { %s410_s28 = scalar_lea.vmem %s409_s27, 256  ;;  %p411_p7 = scmp.lt.s32.totalorder %s625_s11, %s409_s27 }
  0x3e   : > { %p407_p13 = pneg %p406_p12  ;;  %p412_p10 = scmp.lt.s32.totalorder %s410_s28, %s404_s26 }
  0x40   : > { %p413_p2 = por %p412_p10, %p411_p7 }
  0x42   : > { %p414_p4 = pnand %p413_p2, %p407_p13 }
  0xc6   : > { %v190_v2 = vpop.xlane.xlu0 %189 }
  0xc7   : > { %v191_v3 = vmul.f32 0.03125, %v190_v2 }
  0xc9   : > { %v192_v4 = vsub.f32 %v186_v0, %v191_v3 }
  0xcb   : > { %v193_v5 = vmul.f32 %v192_v4, %v192_v4 }
  0xcd   : > { %v194_v6 = vsel %vm187_vm0, %v193_v5, 0.0 }
  0xce   : > { %195 = vadd.xlane.f32.xlu0 %v194_v6 }
 0x15b   : > { %v196_v7 = vpop.xlane.xlu0 %195 }
 0x15c   : > { %v198_v8 = vmul.f32 0.032258064, %v196_v7 }
 0x15e   : > { %370 = vrsqrt.f32 %v198_v8  ;;  %vm201_vm1 = vcmp.eq.f32.partialorder %v198_v8, inf  ;;  %v204_v11 = vand.u32 2147483648, %v198_v8  ;;  %vm203_vm2 = vcmp.eq.f32.partialorder %v198_v8, 0.0 }
 0x168   : > { %v371_v9 = vpop.eup %370 }
 0x169   : > { %v200_v10 = vmul.f32 %v371_v9, %v198_v8 }
 0x16b   : > { %v202_v12 = vsel %vm201_vm1, %v198_v8, %v200_v10 }
 0x16c   : > { %v205_v13 = vsel %vm203_vm2, %v204_v11, %v202_v12 }
 0x16d   : > { %v206_v14 = vadd.f32 1e-06, %v205_v13 }
 0x16f   : > { %372 = vrcp.f32 %v206_v14 }
 0x179   : > { %v373_v15 = vpop.eup %372 }
 0x17a   : > { %v210_v17 = vmul.f32 %v373_v15, %v192_v4 }
 0x17c   : > { %v217_v19 = vmul.f32 %v318_v16, %v210_v17 }
 0x17e   : > { %v224_v20 = vadd.f32 %v319_v18, %v217_v19 }
 0x180   : > { %225 = vst.msk [vmem:[%s185_s10] sm:$0xff] %vm187_vm0, %v224_v20 }
 0x181   : > { %417 = shalt.err (!%p414_p4)
}
 0x182   : > { %s418_s29 = scalar_lea.hbm %s623_s20, 128  ;;  %s422_s7 = scalar_lea.hbm %s671_s3, 256 }
 0x183   : > { %p419_p5 = scmp.ne.s32.totalorder %s623_s20, %s418_s29  ;;  %p423_p0 = scmp.lt.u32.totalorder %s623_s20, %s671_s3 }
 0x184   : > { %p424_p1 = scmp.lt.u32.totalorder %s422_s7, %s418_s29  ;;  %p426_p6 = scmp.lt.u32.totalorder %s418_s29, %s623_s20 }
 0x185   : > { %p420_p8 = pnand %p419_p5, %p680_p11 }
 0x186   : > { %p425_p3 = por %p424_p1, %p423_p0 }
 0x187   : > { %p421_p9 = pneg %p420_p8 }
 0x188   : > { %p427_p12 = por %p426_p6, %p425_p3 }
 0x18a   : > { %p428_p13 = pnand %p427_p12, %p421_p9 }
 0x18c   : > { %431 = shalt.err (!%p428_p13)
}
 0x18d   : > { %326 = dma.vmem_to_hbm [thread:$0]  (%p680_p11), %s625_s11, 128, %s623_s20, %s227_s22  }
 0x18e PF: > { %s252_s6 = sand.u32 1, %s458_s12   ;;  %p681_p7 = scmp.ne.s32.totalorder %s676_s25, 0 }
 0x18f   : > { %p682_p10 = scmp.ge.s32.totalorder %s470_s15, 2  ;;  %s253_s8 = scalar_lea.sflag [#allocation4], %s252_s6 }
 0x191   : > { %p333_p2 = pnand %p682_p10, %p681_p7 }
 0x193   : > { %453 = dma.done.wait (!%p333_p2), %s253_s8, 128  }
 0x194   : > { %455 = vsyncadd (!%p333_p2), %s253_s8, 4294967168  ;;  %p16_p4 = scmp.ge.s32.totalorder %s519_s18, 4   ;;  %s683_s12 = smov %s462_s13 }
 0x195   : > { %s684_s13 = smov %s466_s14  ;;  %s685_s14 = smov %s531_s21 }
 0x196   : > { %s686_s15 = smov %s519_s18  ;;  %18 = sbr.rel (!%p16_p4) target bundleno = 5 (0x5), region = 77 }
 0x19d   :  { %258 = vsyncpa [#allocation3], 1 }
 0x19e   :  { %260 = vsyncpa [#allocation3 + $0x1], 1 }
 0x19f   :  { %261 = vsyncpa [#allocation4], 1 }
 0x1a0   :  { %263 = vsyncpa [#allocation4 + $0x1], 1 }

</bundles_post_ra>
